<compile_context>
chip_gen: v7x
topology: tpu7x:2x2x1
jax: 0.10.0
libtpu: 0.0.40
codegen_flags: <defaults>
</compile_context>

<pallas_src>
import jax
import jax.numpy as jnp
from jax.experimental import pallas as pl
from jax.experimental.pallas import tpu as pltpu

LOG_STD_MAX = 2.0
LOG_STD_MIN = -5.0

LANE = 128      # lane width of a vreg
ROW_TILE = 16   # batch-tile row granularity (bf16 packs 2 rows per sublane)


def _round_up(x, m):
    return (x + m - 1) // m * m


def _cdiv(a, b):
    return -(-a // b)


def gaussian_policy_kernel(obs_ref, w1_ref, b1_ref, w2_ref, b2_ref,
                           w3_ref, b3_ref, mean_ref):
    """One batch tile of the MLP: Linear -> ReLU -> Linear -> ReLU -> Linear.

    obs_ref:  (TB, obs_dim)      f32 (unpadded feature dim; cast in-kernel)
    w1:       (obs_dim, hid_p)   matmul dtype     b1: (1, hid_p)   f32
    w2:       (hid_p,  hid_p)    matmul dtype     b2: (1, hid_p)   f32
    w3:       (hid_p,  act_dim)  matmul dtype     b3: (1, act_dim) f32
    mean_ref: (TB, act_dim)      f32 (unpadded)
    """
    x = obs_ref[...].astype(w1_ref.dtype)     # f32 -> bf16 cast rides the VPU

    # Layer 1: Linear (f32 accumulate) + f32 bias/ReLU epilogue.
    h1 = jnp.dot(x, w1_ref[...], preferred_element_type=jnp.float32) + b1_ref[...]
    h1 = jnp.maximum(h1, 0.0).astype(w2_ref.dtype)

    # Layer 2: Linear + ReLU.
    h2 = jnp.dot(h1, w2_ref[...], preferred_element_type=jnp.float32) + b2_ref[...]
    h2 = jnp.maximum(h2, 0.0).astype(w3_ref.dtype)

    # Output layer: Linear (Identity activation).
    mean = jnp.dot(h2, w3_ref[...], preferred_element_type=jnp.float32) + b3_ref[...]
    mean_ref[...] = mean.astype(mean_ref.dtype)


def prepare_params(params, matmul_dtype=jnp.bfloat16):
    """Pad/cast parameters ONCE (per parameter update), off the hot path.

    Weights are stored [in_features, out_features] (transpose of
    nn.Linear.weight) so each layer is a plain `x @ W + b` on the MXU.
    Only the hidden dim is padded to 128 lanes; obs_dim / act_dim stay
    unpadded (their BlockSpec dims equal the full array dims, which is legal).
    Zero padding is exact: padded columns have zero weight/bias, ReLU(0)=0,
    and padded rows of downstream weights are zero.
    scale_tril = diag(exp(clamp(log_std))) is obs-independent and hoisted
    here as well.
    """
    obs_dim, hidden_dim = params["w1"].shape
    act_dim = params["w3"].shape[1]
    hid_p = _round_up(hidden_dim, LANE)

    def pad2(a, rows, cols, dtype):
        a = jnp.asarray(a, jnp.float32)
        return jnp.pad(a, ((0, rows - a.shape[0]),
                           (0, cols - a.shape[1]))).astype(dtype)

    prepared = dict(
        w1=pad2(params["w1"], obs_dim, hid_p, matmul_dtype),
        b1=pad2(jnp.asarray(params["b1"]).reshape(1, -1), 1, hid_p, jnp.float32),
        w2=pad2(params["w2"], hid_p, hid_p, matmul_dtype),
        b2=pad2(jnp.asarray(params["b2"]).reshape(1, -1), 1, hid_p, jnp.float32),
        w3=pad2(params["w3"], hid_p, act_dim, matmul_dtype),
        b3=jnp.asarray(params["b3"], jnp.float32).reshape(1, act_dim),
        obs_dim=obs_dim, hidden_dim=hidden_dim, act_dim=act_dim, hid_p=hid_p,
        matmul_dtype=jnp.dtype(matmul_dtype),
    )
    log_std = jnp.asarray(params["log_std"], jnp.float32).reshape(-1)
    std = jnp.exp(jnp.clip(log_std, LOG_STD_MIN, LOG_STD_MAX))
    prepared["scale_tril"] = jnp.diag(std)
    return prepared


def gaussian_policy_forward(obs, prepared, *, block_b=1024):
    """Returns (mean, scale_tril) — the MultivariateNormal parameters."""
    B, obs_dim = obs.shape
    assert obs_dim == prepared["obs_dim"], "obs feature dim mismatch"
    act_dim = prepared["act_dim"]
    hid_p = prepared["hid_p"]

    # Balanced batch tiling: tb ~= ceil(B / n_steps), rounded to 16 rows.
    # For B >= 32, force >= 2 grid steps so v7x's two TensorCores both get
    # work under dimension_semantics=("parallel",).
    n_steps = max(_cdiv(B, block_b), 1)
    if B >= 2 * ROW_TILE:
        n_steps = max(n_steps, 2)
    tb = _round_up(_cdiv(B, n_steps), ROW_TILE)
    n_steps = _cdiv(B, tb)
    if B >= 2 * ROW_TILE:
        n_steps = max(n_steps, 2)
    b_p = tb * n_steps

    obs_f32 = jnp.asarray(obs, jnp.float32)
    obs_pd = obs_f32 if b_p == B else jnp.pad(obs_f32, ((0, b_p - B), (0, 0)))

    const = lambda i: (0, 0)       # weights/biases: same block every grid step
    in_specs = [
        pl.BlockSpec((tb, obs_dim), lambda i: (i, 0)),   # obs tile (pipelined)
        pl.BlockSpec((obs_dim, hid_p), const),
        pl.BlockSpec((1, hid_p), const),
        pl.BlockSpec((hid_p, hid_p), const),
        pl.BlockSpec((1, hid_p), const),
        pl.BlockSpec((hid_p, act_dim), const),
        pl.BlockSpec((1, act_dim), const),
    ]
    out_spec = pl.BlockSpec((tb, act_dim), lambda i: (i, 0))

    # Explicit VMEM budget: pipelined obs/mean tiles + resident weights +
    # live f32 intermediates, with 2x slack; capped well below v7x's 64 MiB.
    mm_bytes = prepared["matmul_dtype"].itemsize
    est = 2 * tb * (obs_dim + act_dim) * 4                                  # in/out tiles
    est += 2 * (obs_dim * hid_p + hid_p * hid_p + hid_p * act_dim) * mm_bytes
    est += 2 * (2 * hid_p + act_dim) * 4                                    # biases
    est += 2 * tb * hid_p * 4                                               # h1/h2 values
    vmem_limit = int(min(max(2 * est, 4 << 20), 48 << 20))

    mean_pd = pl.pallas_call(
        gaussian_policy_kernel,
        out_shape=jax.ShapeDtypeStruct((b_p, act_dim), jnp.float32),
        grid=(n_steps,),
        in_specs=in_specs,
        out_specs=out_spec,
        compiler_params=pltpu.CompilerParams(
            dimension_semantics=("parallel",),   # v7x: shard batch over 2 TCs
            vmem_limit_bytes=vmem_limit,
        ),
    )(obs_pd, prepared["w1"], prepared["b1"], prepared["w2"], prepared["b2"],
      prepared["w3"], prepared["b3"])

    mean = mean_pd if b_p == B else mean_pd[:B]
    return mean, prepared["scale_tril"]


def init_params(key, obs_dim, act_dim, hidden_dim):
    """Deterministic synthetic parameters (PyTorch-Linear-like uniform init)."""
    def linear(k, fan_in, fan_out):
        kw, kb = jax.random.split(k)
        bound = 1.0 / jnp.sqrt(fan_in)
        w = jax.random.uniform(kw, (fan_in, fan_out), jnp.float32, -bound, bound)
        b = jax.random.uniform(kb, (1, fan_out), jnp.float32, -bound, bound)
        return w, b

    k1, k2, k3 = jax.random.split(key, 3)
    w1, b1 = linear(k1, obs_dim, hidden_dim)
    w2, b2 = linear(k2, hidden_dim, hidden_dim)
    w3, b3 = linear(k3, hidden_dim, act_dim)
    log_std = jnp.zeros((act_dim,), jnp.float32)   # nn.Parameter(torch.zeros(act_dim))
    return dict(w1=w1, b1=b1, w2=w2, b2=b2, w3=w3, b3=b3, log_std=log_std)


def _reference_forward(obs, p, matmul_dtype=jnp.bfloat16):
    """Pure-JAX reference using the same matmul-dtype / f32-accumulate math."""
    dt = matmul_dtype
    x = jnp.asarray(obs, jnp.float32).astype(dt)
    h1 = jnp.dot(x, p["w1"].astype(dt),
                 preferred_element_type=jnp.float32) + p["b1"]
    h1 = jnp.maximum(h1, 0.0)
    h2 = jnp.dot(h1.astype(dt), p["w2"].astype(dt),
                 preferred_element_type=jnp.float32) + p["b2"]
    h2 = jnp.maximum(h2, 0.0)
    mean = jnp.dot(h2.astype(dt), p["w3"].astype(dt),
                   preferred_element_type=jnp.float32) + p["b3"]
    std = jnp.exp(jnp.clip(jnp.asarray(p["log_std"]).reshape(-1),
                           LOG_STD_MIN, LOG_STD_MAX))
    return mean, jnp.diag(std)


if __name__ == "__main__":
    # Small shapes consistent with the module (obs_dim -> hidden -> hidden -> act_dim).
    # batch=40 exercises row padding + a 2-step batch grid; act_dim=6 exercises
    # the unpadded (narrow) output path.
    batch, obs_dim, hidden_dim, act_dim = 40, 16, 32, 6

    key = jax.random.PRNGKey(0)
    k_params, k_obs = jax.random.split(key)
    params = init_params(k_params, obs_dim, act_dim, hidden_dim)
    obs = jax.random.normal(k_obs, (batch, obs_dim), jnp.float32)

    prepared = prepare_params(params)              # once per parameter update
    mean, scale_tril = jax.block_until_ready(
        gaussian_policy_forward(obs, prepared, block_b=1024))

    # Sanity check against a pure-JAX reference of the same (bf16-matmul) math.
    ref_mean, ref_tril = _reference_forward(obs, params)
    assert mean.shape == (batch, act_dim)
    assert scale_tril.shape == (act_dim, act_dim)
    assert jnp.allclose(mean, ref_mean, atol=1e-3, rtol=1e-3), \
        float(jnp.max(jnp.abs(mean - ref_mean)))
    assert jnp.allclose(scale_tril, ref_tril, atol=1e-6, rtol=1e-6)

    print("KERNEL_OK")
</pallas_src>

<mosaic_0001>
module attributes {stable_mosaic.version = 11 : i64} {
  func.func @gaussian_policy_kernel(%arg0: i32, %arg1: memref<32x16xf32, #tpu.memory_space<vmem>>, %arg2: memref<16x128xbf16, #tpu.memory_space<vmem>>, %arg3: memref<1x128xf32, #tpu.memory_space<vmem>>, %arg4: memref<128x128xbf16, #tpu.memory_space<vmem>>, %arg5: memref<1x128xf32, #tpu.memory_space<vmem>>, %arg6: memref<128x6xbf16, #tpu.memory_space<vmem>>, %arg7: memref<1x6xf32, #tpu.memory_space<vmem>>, %arg8: memref<32x6xf32, #tpu.memory_space<vmem>>) attributes {dimension_semantics = [#tpu.dimension_semantics<parallel>], iteration_bounds = array<i64: 2>, scalar_prefetch = 0 : i64, scratch_operands = 0 : i64, tpu.core_type = #tpu.core_type<tc>, window_params = [{transform_indices = @transform_0, window_bounds = array<i64: 32, 16>}, {pipeline_mode = #tpu.pipeline_mode<synchronous>, transform_indices = @transform_1, window_bounds = array<i64: 16, 128>}, {pipeline_mode = #tpu.pipeline_mode<synchronous>, transform_indices = @transform_2, window_bounds = array<i64: 1, 128>}, {pipeline_mode = #tpu.pipeline_mode<synchronous>, transform_indices = @transform_3, window_bounds = array<i64: 128, 128>}, {pipeline_mode = #tpu.pipeline_mode<synchronous>, transform_indices = @transform_4, window_bounds = array<i64: 1, 128>}, {pipeline_mode = #tpu.pipeline_mode<synchronous>, transform_indices = @transform_5, window_bounds = array<i64: 128, 6>}, {pipeline_mode = #tpu.pipeline_mode<synchronous>, transform_indices = @transform_6, window_bounds = array<i64: 1, 6>}, {transform_indices = @transform_7, window_bounds = array<i64: 32, 6>}]} {
    %c0 = arith.constant 0 : index
    %c0_0 = arith.constant 0 : index
    %0 = vector.load %arg1[%c0, %c0_0] : memref<32x16xf32, #tpu.memory_space<vmem>>, vector<32x16xf32>
    %1 = arith.truncf %0 : vector<32x16xf32> to vector<32x16xbf16>
    %c0_1 = arith.constant 0 : index
    %c0_2 = arith.constant 0 : index
    %2 = vector.load %arg2[%c0_1, %c0_2] : memref<16x128xbf16, #tpu.memory_space<vmem>>, vector<16x128xbf16>
    %cst = arith.constant dense<0.000000e+00> : vector<32x128xf32>
    %3 = tpu.matmul %1, %2, %cst {dimension_numbers = #tpu.dot_dimension_numbers<[1], [0], [0], [1], [0, 0, 1, 1], [], []>} : vector<32x16xbf16>, vector<16x128xbf16>, vector<32x128xf32> -> vector<32x128xf32>
    %c0_3 = arith.constant 0 : index
    %c0_4 = arith.constant 0 : index
    %4 = vector.load %arg3[%c0_3, %c0_4] : memref<1x128xf32, #tpu.memory_space<vmem>>, vector<1x128xf32>
    %5 = vector.broadcast %4 : vector<1x128xf32> to vector<32x128xf32>
    %6 = arith.addf %3, %5 : vector<32x128xf32>
    %cst_5 = arith.constant 0.000000e+00 : f32
    %7 = vector.broadcast %cst_5 : f32 to vector<32x128xf32>
    %8 = arith.maximumf %6, %7 : vector<32x128xf32>
    %9 = arith.truncf %8 : vector<32x128xf32> to vector<32x128xbf16>
    %c0_6 = arith.constant 0 : index
    %c0_7 = arith.constant 0 : index
    %10 = vector.load %arg4[%c0_6, %c0_7] : memref<128x128xbf16, #tpu.memory_space<vmem>>, vector<128x128xbf16>
    %cst_8 = arith.constant dense<0.000000e+00> : vector<32x128xf32>
    %11 = tpu.matmul %9, %10, %cst_8 {dimension_numbers = #tpu.dot_dimension_numbers<[1], [0], [0], [1], [0, 0, 1, 1], [], []>} : vector<32x128xbf16>, vector<128x128xbf16>, vector<32x128xf32> -> vector<32x128xf32>
    %c0_9 = arith.constant 0 : index
    %c0_10 = arith.constant 0 : index
    %12 = vector.load %arg5[%c0_9, %c0_10] : memref<1x128xf32, #tpu.memory_space<vmem>>, vector<1x128xf32>
    %13 = vector.broadcast %12 : vector<1x128xf32> to vector<32x128xf32>
    %14 = arith.addf %11, %13 : vector<32x128xf32>
    %cst_11 = arith.constant 0.000000e+00 : f32
    %15 = vector.broadcast %cst_11 : f32 to vector<32x128xf32>
    %16 = arith.maximumf %14, %15 : vector<32x128xf32>
    %17 = arith.truncf %16 : vector<32x128xf32> to vector<32x128xbf16>
    %c0_12 = arith.constant 0 : index
    %c0_13 = arith.constant 0 : index
    %18 = vector.load %arg6[%c0_12, %c0_13] : memref<128x6xbf16, #tpu.memory_space<vmem>>, vector<128x6xbf16>
    %cst_14 = arith.constant dense<0.000000e+00> : vector<32x6xf32>
    %19 = tpu.matmul %17, %18, %cst_14 {dimension_numbers = #tpu.dot_dimension_numbers<[1], [0], [0], [1], [0, 0, 1, 1], [], []>} : vector<32x128xbf16>, vector<128x6xbf16>, vector<32x6xf32> -> vector<32x6xf32>
    %c0_15 = arith.constant 0 : index
    %c0_16 = arith.constant 0 : index
    %20 = vector.load %arg7[%c0_15, %c0_16] : memref<1x6xf32, #tpu.memory_space<vmem>>, vector<1x6xf32>
    %21 = vector.broadcast %20 : vector<1x6xf32> to vector<32x6xf32>
    %22 = arith.addf %19, %21 : vector<32x6xf32>
    %c0_17 = arith.constant 0 : index
    %c0_18 = arith.constant 0 : index
    %23 = vector.load %arg8[%c0_17, %c0_18] : memref<32x6xf32, #tpu.memory_space<vmem>>, vector<32x6xf32>
    tpu.vector_store %arg8[%c0_17, %c0_18], %22 {strides = array<i32>} : memref<32x6xf32, #tpu.memory_space<vmem>>, vector<32x6xf32>,
    return
  }
  func.func @transform_0(%arg0: i32) -> (i32, i32) {
    %c0_i32 = arith.constant 0 : i32
    %c0_i32_0 = arith.constant 0 : i32
    return %arg0, %c0_i32 : i32, i32
  }
  func.func @transform_1(%arg0: i32) -> (i32, i32) {
    %c0_i32 = arith.constant 0 : i32
    %c0_i32_0 = arith.constant 0 : i32
    %c0_i32_1 = arith.constant 0 : i32
    return %c0_i32, %c0_i32_0 : i32, i32
  }
  func.func @transform_2(%arg0: i32) -> (i32, i32) {
    %c0_i32 = arith.constant 0 : i32
    %c0_i32_0 = arith.constant 0 : i32
    %c0_i32_1 = arith.constant 0 : i32
    return %c0_i32, %c0_i32_0 : i32, i32
  }
  func.func @transform_3(%arg0: i32) -> (i32, i32) {
    %c0_i32 = arith.constant 0 : i32
    %c0_i32_0 = arith.constant 0 : i32
    %c0_i32_1 = arith.constant 0 : i32
    return %c0_i32, %c0_i32_0 : i32, i32
  }
  func.func @transform_4(%arg0: i32) -> (i32, i32) {
    %c0_i32 = arith.constant 0 : i32
    %c0_i32_0 = arith.constant 0 : i32
    %c0_i32_1 = arith.constant 0 : i32
    return %c0_i32, %c0_i32_0 : i32, i32
  }
  func.func @transform_5(%arg0: i32) -> (i32, i32) {
    %c0_i32 = arith.constant 0 : i32
    %c0_i32_0 = arith.constant 0 : i32
    %c0_i32_1 = arith.constant 0 : i32
    return %c0_i32, %c0_i32_0 : i32, i32
  }
  func.func @transform_6(%arg0: i32) -> (i32, i32) {
    %c0_i32 = arith.constant 0 : i32
    %c0_i32_0 = arith.constant 0 : i32
    %c0_i32_1 = arith.constant 0 : i32
    return %c0_i32, %c0_i32_0 : i32, i32
  }
  func.func @transform_7(%arg0: i32) -> (i32, i32) {
    %c0_i32 = arith.constant 0 : i32
    %c0_i32_0 = arith.constant 0 : i32
    return %arg0, %c0_i32 : i32, i32
  }
}

</mosaic_0001>

<bundles_post_ra>
// kernel: tpu_custom_call.1
= control target key start
LH: loop header
LB: loop body
LE: loop exit
PB: predicated region body
PF: predicated region fallthrough
CT: control target
= control target key end

     0   :  { %s848_s24 = smov 0   ;;  %s932_s0 = inlined_call_operand.vmem [shape: f32[64,16], index: 0, kind: input, shape index: {}]   ;;  %s933_s1 = inlined_call_operand.vmem [shape: bf16[16,128], index: 1, kind: input, shape index: {}]   ;;  %s934_s2 = inlined_call_operand.vmem [shape: f32[1,128], index: 2, kind: input, shape index: {}]   ;;  %s935_s3 = inlined_call_operand.vmem [shape: bf16[128,128], index: 3, kind: input, shape index: {}]   ;;  %s936_s4 = inlined_call_operand.vmem [shape: f32[1,128], index: 4, kind: input, shape index: {}]   ;;  %s937_s5 = inlined_call_operand.vmem [shape: bf16[128,6], index: 5, kind: input, shape index: {}]   ;;  %s938_s6 = inlined_call_operand.vmem [shape: f32[1,6], index: 6, kind: input, shape index: {}]   ;;  %s939_s7 = inlined_call_operand.vmem [shape: f32[64,6], index: 7, kind: output, shape index: {}]  }
   0x1 LB: > { %s673_s25 = sadd.s32 4294967295, %s806_s24   ;;  %p677_p0 = scmp.ge.s32.totalorder %s806_s24, 1  ;;  %s806_s24 = sphi %s848_s24, %s17_s24  }
   0x2   : > { %p238_p1 = scmp.lt.s32.totalorder %s806_s24, 3 }
   0x4   : > { %p239_p2 = pnand %p677_p0, %p238_p1 }
   0x5   : > { %v783_v0 = vld [vmem:[%s933_s1] sm:$0xff] (!%p239_p2)   ;;  %s678_s28 = sshll.u32 (!%p239_p2), %s673_s25, 2  ;;  %v785_v2 = vld [vmem:[%s935_s3 + $0x8] sm:$0xff] (!%p239_p2)   ;;  %v786_v3 = vld [vmem:[%s935_s3 + $0x10] sm:$0xff] (!%p239_p2)   ;;  %vm304_vm0 = vcmask (!%p239_p2), 130048   ;;  %vm612_vm1 = vcmask (!%p239_p2), 48128  }
   0x6   : > { %242 = sbr.rel (%p239_p2) target bundleno = 682 (0x2aa), region = 48  ;;  %p271_p3 = scmp.lt.s32.totalorder (!%p239_p2), %s678_s28, 7  ;;  %729 = vmatprep.subr.bf16.mxu0 (!%p239_p2), %v783_v0  ;;  %v784_v1 = vld [vmem:[%s935_s3] sm:$0xff] (!%p239_p2)   ;;  %v787_v9 = vld [vmem:[%s935_s3 + $0x18] sm:$0xff] (!%p239_p2)   ;;  %v789_v12 = vld [vmem:[%s935_s3 + $0x28] sm:$0xff] (!%p239_p2)  }
   0x7   : > { %730 = vmatpush3.bf16.msra.mxu0 (!%p239_p2), %v783_v0  ;;  %735 = vmatprep.subr.bf16.mxu1 (!%p239_p2), %v784_v1  ;;  %v788_v11 = vld [vmem:[%s935_s3 + $0x20] sm:$0xff] (!%p239_p2)   ;;  %v790_v13 = vld [vmem:[%s935_s3 + $0x30] sm:$0xff] (!%p239_p2)   ;;  %v791_v14 = vld [vmem:[%s935_s3 + $0x38] sm:$0xff] (!%p239_p2)  }
   0x8   : > { %736 = vmatpush3.bf16.msra.mxu1 (!%p239_p2), %v784_v1  ;;  %v792_v15 = vld [vmem:[%s937_s5] sm:$0xff] (!%p239_p2)   ;;  %v793_v16 = vld [vmem:[%s937_s5 + $0x8] sm:$0xff] (!%p239_p2)   ;;  %v794_v17 = vld [vmem:[%s937_s5 + $0x10] sm:$0xff] (!%p239_p2)  }
   0x9   : > { %737 = vmatprep.subr.bf16.mxu1 (!%p239_p2), %v785_v2  ;;  %755 = vmatprep.subr.bf16.mxu0 (!%p239_p2), %v792_v15  ;;  %v795_v18 = vld [vmem:[%s937_s5 + $0x18] sm:$0xff] (!%p239_p2)   ;;  %v796_v19 = vld [vmem:[%s937_s5 + $0x20] sm:$0xff] (!%p239_p2)   ;;  %v797_v20 = vld [vmem:[%s937_s5 + $0x28] sm:$0xff] (!%p239_p2)  }
   0xa   : > { %v682_v21 = vld [vmem:[%s934_s2] ss:$0 sm:$0xff] (!%p239_p2)  ;;  %v798_v36 = vld [vmem:[%s937_s5 + $0x30] sm:$0xff] (!%p239_p2)   ;;  %v799_v37 = vld [vmem:[%s937_s5 + $0x38] sm:$0xff] (!%p239_p2)  }
   0xb   : > { %v686_v38 = vld [vmem:[%s936_s4] ss:$0 sm:$0xff] (!%p239_p2) }
   0xc   : > { %738 = vmatpush3.bf16.msra.mxu1 (!%p239_p2), %v785_v2  ;;  %v695_v53 = vld [vmem:[%s938_s6] ss:$0 sm:$0xff] (!%p239_p2) }
   0xd   : > { %s941_s28 = smov (!%p271_p3, %s678_s28), 7  ;;  %739 = vmatprep.subr.bf16.mxu1 %v786_v3 }
   0xe   : > { %s679_s10 = sshll.u32 %s941_s28, 3 }
   0xf   : > { %s274_s13 = scalar_lea.vmem %s932_s0, %s679_s10  ;;  %s280_s9 = scalar_lea.vmem %s939_s7, %s679_s10 }
  0x10   : > { %v283_v4 = vld [vmem:[%s274_s13] sm:$0xff]  ;;  %v284_v5 = vld [vmem:[%s274_s13 + $0x8] sm:$0xff]  ;;  %v285_v6 = vld [vmem:[%s274_s13 + $0x10] sm:$0xff]  ;;  %740 = vmatpush3.bf16.msra.mxu1 %v786_v3 }
  0x11   : > { %v287_v7 = vpack.c.bf16 %v284_v5, %v283_v4  ;;  %v286_v8 = vld [vmem:[%s274_s13 + $0x18] sm:$0xff]  ;;  %741 = vmatprep.subr.bf16.mxu1 %v787_v9 }
  0x12   : > { %v288_v10 = vpack.c.bf16 %v286_v8, %v285_v6 }
  0x13   : > { %731 = vmatprep.mubr.msk.bf16.mxu0 %vm304_vm0, %v287_v7 }
  0x14   : > { %732 = vmatmul.mubr.msk.bf16.vlgmr.msra.gmra.mrb[0].mxu0 %vm304_vm0, %v288_v10  ;;  %742 = vmatpush3.bf16.msra.mxu1 %v787_v9 }
  0x15   : > { %743 = vmatprep.subr.bf16.mxu1 %v788_v11  ;;  %756 = vmatpush3.bf16.msra.mxu0 %v792_v15 }
  0x16   : > { %757 = vmatprep.subr.bf16.mxu0 %v793_v16 }
  0x18   : > { %744 = vmatpush3.bf16.msra.mxu1 %v788_v11 }
  0x19   : > { %745 = vmatprep.subr.bf16.mxu1 %v789_v12  ;;  %758 = vmatpush3.bf16.msra.mxu0 %v793_v16 }
  0x1a   : > { %759 = vmatprep.subr.bf16.mxu0 %v794_v17 }
  0x1c   : > { %746 = vmatpush3.bf16.msra.mxu1 %v789_v12 }
  0x1d   : > { %747 = vmatprep.subr.bf16.mxu1 %v790_v13  ;;  %760 = vmatpush3.bf16.msra.mxu0 %v794_v17 }
  0x1e   : > { %761 = vmatprep.subr.bf16.mxu0 %v795_v18 }
  0x20   : > { %748 = vmatpush3.bf16.msra.mxu1 %v790_v13 }
  0x21   : > { %749 = vmatprep.subr.bf16.mxu1 %v791_v14  ;;  %762 = vmatpush3.bf16.msra.mxu0 %v795_v18 }
  0x22   : > { %763 = vmatprep.subr.bf16.mxu0 %v796_v19 }
  0x24   : > { %750 = vmatpush3.bf16.msra.mxu1 %v791_v14 }
  0x25   : > { %764 = vmatpush3.bf16.msra.mxu0 %v796_v19 }
  0x26   : > { %765 = vmatprep.subr.bf16.mxu0 %v797_v20 }
  0x29   : > { %766 = vmatpush3.bf16.msra.mxu0 %v797_v20 }
  0x2a   : > { %767 = vmatprep.subr.bf16.mxu0 %v798_v36 }
  0x2d   : > { %768 = vmatpush3.bf16.msra.mxu0 %v798_v36 }
  0x2e   : > { %769 = vmatprep.subr.bf16.mxu0 %v799_v37 }
  0x31   : > { %770 = vmatpush3.bf16.msra.mxu0 %v799_v37 }
  0xe7   : > { %v733_v22 = vpop.f32.mrb[0].mxu0 }
  0xe8   : > { %v354_v23 = vadd.f32 %v733_v22, %v682_v21  ;;  %v345_v24 = vpop.f32.mrb[1].mxu0 }
  0xe9   : > { %v346_v25 = vadd.f32 %v682_v21, %v345_v24  ;;  %v734_v26 = vpop.f32.mrb[2].mxu0 }
  0xea   : > { %v357_v27 = vadd.f32 %v734_v26, %v682_v21  ;;  %v348_v28 = vpop.f32.mrb[3].mxu0  ;;  %v362_v30 = vmax.f32 %v354_v23, 0.0 }
  0xeb   : > { %v349_v29 = vadd.f32 %v682_v21, %v348_v28  ;;  %v360_v32 = vmax.f32 %v346_v25, 0.0 }
  0xec   : > { %v363_v31 = vmax.f32 %v357_v27, 0.0 }
  0xed   : > { %v361_v33 = vmax.f32 %v349_v29, 0.0 }
  0xee   : > { %v365_v34 = vpack.c.bf16 %v363_v31, %v362_v30 }
  0xef   : > { %v364_v35 = vpack.c.bf16 %v361_v33, %v360_v32 }
  0xf1   : > { %751 = vmatprep.mubr.bf16.mxu1 %v364_v35 }
  0xf2   : > { %752 = vmatmul.mubr.bf16.vlgmr.msra.gmra.mrb[0].mxu1 %v365_v34 }
 0x1c5   : > { %v753_v39 = vpop.f32.mrb[0].mxu1 }
 0x1c6   : > { %v480_v40 = vadd.f32 %v753_v39, %v686_v38  ;;  %v471_v41 = vpop.f32.mrb[1].mxu1 }
 0x1c7   : > { %v472_v42 = vadd.f32 %v686_v38, %v471_v41  ;;  %v754_v43 = vpop.f32.mrb[2].mxu1 }
 0x1c8   : > { %v483_v44 = vadd.f32 %v754_v43, %v686_v38  ;;  %v474_v45 = vpop.f32.mrb[3].mxu1  ;;  %v488_v47 = vmax.f32 %v480_v40, 0.0 }
 0x1c9   : > { %v475_v46 = vadd.f32 %v686_v38, %v474_v45  ;;  %v486_v49 = vmax.f32 %v472_v42, 0.0 }
 0x1ca   : > { %v489_v48 = vmax.f32 %v483_v44, 0.0 }
 0x1cb   : > { %v487_v50 = vmax.f32 %v475_v46, 0.0 }
 0x1cc   : > { %v491_v51 = vpack.c.bf16 %v489_v48, %v488_v47 }
 0x1cd   : > { %v490_v52 = vpack.c.bf16 %v487_v50, %v486_v49 }
 0x1cf   : > { %771 = vmatprep.mubr.bf16.mxu0 %v490_v52 }
 0x1d0   : > { %772 = vmatmul.mubr.bf16.vlgmr.msra.gmra.mrb[4].mxu0 %v491_v51 }
 0x2a3   : > { %v773_v54 = vpop.f32.mrb[4].mxu0 }
 0x2a4   : > { %v597_v55 = vpop.f32.mrb[5].mxu0  ;;  %v606_v60 = vadd.f32 %v773_v54, %v695_v53 }
 0x2a5   : > { %v598_v56 = vadd.f32 %v695_v53, %v597_v55  ;;  %v774_v57 = vpop.f32.mrb[6].mxu0 }
 0x2a6   : > { %v600_v58 = vpop.f32.mrb[7].mxu0  ;;  %v609_v61 = vadd.f32 %v774_v57, %v695_v53  ;;  %615 = vst.msk [vmem:[%s280_s9 + $0x10] sm:$0xff] %vm612_vm1, %v606_v60 }
 0x2a7   : > { %613 = vst.msk [vmem:[%s280_s9] sm:$0xff] %vm612_vm1, %v598_v56  ;;  %v601_v59 = vadd.f32 %v695_v53, %v600_v58 }
 0x2a8   : > { %616 = vst.msk [vmem:[%s280_s9 + $0x18] sm:$0xff] %vm612_vm1, %v609_v61 }
 0x2a9   : > { %614 = vst.msk [vmem:[%s280_s9 + $0x8] sm:$0xff] %vm612_vm1, %v601_v59 }
 0x2aa PF: > { %s17_s24 = sadd.s32 1, %s806_s24  }
 0x2ab   : > { %p14_p4 = scmp.ge.s32.totalorder %s17_s24, 4  }
 0x2ad   :  { %16 = sbr.rel (!%p14_p4) target bundleno = 1 (0x1), region = 78 }

</bundles_post_ra>
